<compile_context>
chip_gen: v7x
topology: tpu7x:2x2x1
jax: 0.10.0
libtpu: 0.0.40
codegen_flags: <defaults>
</compile_context>

<pallas_src>
import numpy as np
import jax
import jax.numpy as jnp
from jax.experimental import pallas as pl
from jax.experimental.pallas import tpu as pltpu


def _round_up(v, m):
    return (v + m - 1) // m * m


def _cdiv(a, b):
    return (a + b - 1) // b


def _siamese_tail_kernel(x_ref, w1_ref, b1_ref, w2_ref, b2_ref, w3_ref, b3_ref,
                         o_ref):
    # In-kernel cast of the f32 input tile to bf16 (MXU-native) — avoids a
    # separate XLA pad/cast pass over x in HBM.
    x = x_ref[...].astype(w1_ref.dtype)

    # Layer 1: Linear (bf16 in, f32 acc) + bias + ReLU6
    h1 = jnp.dot(x, w1_ref[...], preferred_element_type=jnp.float32)
    h1 = jnp.clip(h1 + b1_ref[...], 0.0, 6.0)
    # Dropout(p=0.1) -> identity in eval mode.

    # Layer 2: Linear + bias + ReLU6
    h2 = jnp.dot(h1.astype(w2_ref.dtype), w2_ref[...],
                 preferred_element_type=jnp.float32)
    h2 = jnp.clip(h2 + b2_ref[...], 0.0, 6.0)
    # Dropout(p=0.1) -> identity in eval mode.

    # Layer 3: Linear + bias (no activation)
    out = jnp.dot(h2.astype(w3_ref.dtype), w3_ref[...],
                  preferred_element_type=jnp.float32)
    o_ref[...] = (out + b3_ref[...]).astype(o_ref.dtype)


def prepare_params(params, compute_dtype=jnp.bfloat16):
    """One-time weight prep: pad hidden dims to 128 lanes, cast matmul weights
    to bf16.  d_in (w1 rows) and out_dim (w3 cols / b3) are left unpadded —
    full-extent blocks are legal and avoid zero-K / zero-lane waste.
    Biases stay f32 for the f32 epilogue."""
    w1, b1, w2, b2, w3, b3 = params
    f1 = w1.shape[1]
    f2 = w2.shape[1]
    f1_p = _round_up(f1, 128)
    f2_p = _round_up(f2, 128)

    w1_p = jnp.pad(w1, ((0, 0), (0, f1_p - f1))).astype(compute_dtype)
    b1_p = jnp.pad(b1, ((0, 0), (0, f1_p - f1)))
    w2_p = jnp.pad(w2, ((0, f1_p - f1), (0, f2_p - f2))).astype(compute_dtype)
    b2_p = jnp.pad(b2, ((0, 0), (0, f2_p - f2)))
    w3_p = jnp.pad(w3, ((0, f2_p - f2), (0, 0))).astype(compute_dtype)
    b3_p = b3  # f32, real out_dim
    return (w1_p, b1_p, w2_p, b2_p, w3_p, b3_p)


def siamese_tail_forward(x, prepared_params, *, tb_target=2048):
    """x: (B, n_branches * branch_embedding_size) float32.
    prepared_params: output of prepare_params (padded/cast once, reused)."""
    w1_p, b1_p, w2_p, b2_p, w3_p, b3_p = prepared_params
    B, d_in = x.shape
    assert w1_p.shape[0] == d_in
    f1_p = w1_p.shape[1]
    f2_p = w2_p.shape[1]
    out_dim = w3_p.shape[1]

    # --- Batch tiling: balanced tiles (little padding waste), >=2 tiles when
    # B allows so v7x's two TensorCores both get work; 16-row granularity
    # keeps bf16-friendly sublane alignment on v5e. TB <= tb_target (<=2048)
    # keeps VMEM footprint small on all generations. ---------------------
    n_tiles = max(1, _cdiv(B, tb_target))
    if n_tiles == 1 and B > 16:
        n_tiles = 2
    TB = _round_up(_cdiv(B, n_tiles), 16)
    B_pad = _round_up(B, TB)
    grid = (B_pad // TB,)

    # Only batch padding (zero rows) — no feature padding of x.
    x_p = x if B_pad == B else jnp.pad(x, ((0, B_pad - B), (0, 0)))

    vmem = pltpu.MemorySpace.VMEM
    grid_spec = pltpu.PrefetchScalarGridSpec(
        num_scalar_prefetch=0,
        grid=grid,
        in_specs=[
            # x: tiled along batch, full (unpadded) feature extent, native f32.
            pl.BlockSpec((TB, d_in), lambda i: (i, 0), memory_space=vmem),
            # Weights / biases: constant index_map -> VMEM-resident across
            # all grid steps (no per-step re-DMA).
            pl.BlockSpec((d_in, f1_p), lambda i: (0, 0), memory_space=vmem),
            pl.BlockSpec((1, f1_p), lambda i: (0, 0), memory_space=vmem),
            pl.BlockSpec((f1_p, f2_p), lambda i: (0, 0), memory_space=vmem),
            pl.BlockSpec((1, f2_p), lambda i: (0, 0), memory_space=vmem),
            pl.BlockSpec((f2_p, out_dim), lambda i: (0, 0), memory_space=vmem),
            pl.BlockSpec((1, out_dim), lambda i: (0, 0), memory_space=vmem),
        ],
        # Output at the real out_dim (full-extent last dim) -> no padded
        # writeback slab and no post-call feature slice.
        out_specs=pl.BlockSpec((TB, out_dim), lambda i: (i, 0),
                               memory_space=vmem),
    )

    out_padded = pl.pallas_call(
        _siamese_tail_kernel,
        out_shape=jax.ShapeDtypeStruct((B_pad, out_dim), x.dtype),
        grid_spec=grid_spec,
        compiler_params=pltpu.CompilerParams(
            dimension_semantics=("parallel",),  # batch tiles are independent
        ),
    )(x_p, w1_p, b1_p, w2_p, b2_p, w3_p, b3_p)

    # Strip batch padding only.
    return out_padded[:B] if B_pad != B else out_padded


def init_params(key, n_branches, branch_embedding_size, out_embedding_size):
    """Deterministic init mirroring nn.Linear default (uniform +-1/sqrt(fan_in))."""
    sqrt_mult = np.sqrt(n_branches)
    f1 = int(np.round(128 * sqrt_mult))
    f2 = int(np.round(64 * sqrt_mult))
    d_in = branch_embedding_size * n_branches

    dims = [(d_in, f1), (f1, f2), (f2, out_embedding_size)]
    params = []
    for (fan_in, fan_out) in dims:
        key, kw, kb = jax.random.split(key, 3)
        bound = 1.0 / np.sqrt(fan_in)
        w = jax.random.uniform(kw, (fan_in, fan_out), jnp.float32,
                               minval=-bound, maxval=bound)
        b = jax.random.uniform(kb, (1, fan_out), jnp.float32,
                               minval=-bound, maxval=bound)
        params.extend([w, b])
    return tuple(params)


def reference_forward(x, params):
    """Plain-JAX f32 reference for correctness check (eval mode)."""
    w1, b1, w2, b2, w3, b3 = params
    h1 = jnp.clip(x @ w1 + b1, 0.0, 6.0)
    h2 = jnp.clip(h1 @ w2 + b2, 0.0, 6.0)
    return h2 @ w3 + b3


if __name__ == "__main__":
    n_branches = 4
    branch_embedding_size = 8
    out_embedding_size = 16
    batch = 2

    key = jax.random.PRNGKey(0)
    key_x, key_p = jax.random.split(key)

    x = jax.random.normal(
        key_x, (batch, n_branches * branch_embedding_size), jnp.float32)
    params = init_params(key_p, n_branches, branch_embedding_size,
                         out_embedding_size)

    # Weights are padded/cast once and reused across forward calls.
    prepared = prepare_params(params)

    out = siamese_tail_forward(x, prepared)
    out = jax.block_until_ready(out)

    ref = reference_forward(x, params)
    # bf16 matmul inputs with f32 accumulation -> small deviation vs f32 ref.
    np.testing.assert_allclose(np.asarray(out), np.asarray(ref),
                               rtol=2e-2, atol=2e-2)

    print("KERNEL_OK")
</pallas_src>

<mosaic_0001>
module attributes {stable_mosaic.version = 11 : i64} {
  func.func @_siamese_tail_kernel(%arg0: i32, %arg1: memref<16x32xf32, #tpu.memory_space<vmem>>, %arg2: memref<32x256xbf16, #tpu.memory_space<vmem>>, %arg3: memref<1x256xf32, #tpu.memory_space<vmem>>, %arg4: memref<256x128xbf16, #tpu.memory_space<vmem>>, %arg5: memref<1x128xf32, #tpu.memory_space<vmem>>, %arg6: memref<128x16xbf16, #tpu.memory_space<vmem>>, %arg7: memref<1x16xf32, #tpu.memory_space<vmem>>, %arg8: memref<16x16xf32, #tpu.memory_space<vmem>>) attributes {dimension_semantics = [#tpu.dimension_semantics<parallel>], iteration_bounds = array<i64: 1>, scalar_prefetch = 0 : i64, scratch_operands = 0 : i64, tpu.core_type = #tpu.core_type<tc>, window_params = [{transform_indices = @transform_0, window_bounds = array<i64: 16, 32>}, {pipeline_mode = #tpu.pipeline_mode<synchronous>, transform_indices = @transform_1, window_bounds = array<i64: 32, 256>}, {pipeline_mode = #tpu.pipeline_mode<synchronous>, transform_indices = @transform_2, window_bounds = array<i64: 1, 256>}, {pipeline_mode = #tpu.pipeline_mode<synchronous>, transform_indices = @transform_3, window_bounds = array<i64: 256, 128>}, {pipeline_mode = #tpu.pipeline_mode<synchronous>, transform_indices = @transform_4, window_bounds = array<i64: 1, 128>}, {pipeline_mode = #tpu.pipeline_mode<synchronous>, transform_indices = @transform_5, window_bounds = array<i64: 128, 16>}, {pipeline_mode = #tpu.pipeline_mode<synchronous>, transform_indices = @transform_6, window_bounds = array<i64: 1, 16>}, {transform_indices = @transform_7, window_bounds = array<i64: 16, 16>}]} {
    %c0 = arith.constant 0 : index
    %c0_0 = arith.constant 0 : index
    %0 = vector.load %arg1[%c0, %c0_0] : memref<16x32xf32, #tpu.memory_space<vmem>>, vector<16x32xf32>
    %1 = arith.truncf %0 : vector<16x32xf32> to vector<16x32xbf16>
    %c0_1 = arith.constant 0 : index
    %c0_2 = arith.constant 0 : index
    %2 = vector.load %arg2[%c0_1, %c0_2] : memref<32x256xbf16, #tpu.memory_space<vmem>>, vector<32x256xbf16>
    %cst = arith.constant dense<0.000000e+00> : vector<16x256xf32>
    %3 = tpu.matmul %1, %2, %cst {dimension_numbers = #tpu.dot_dimension_numbers<[1], [0], [0], [1], [0, 0, 1, 1], [], []>} : vector<16x32xbf16>, vector<32x256xbf16>, vector<16x256xf32> -> vector<16x256xf32>
    %c0_3 = arith.constant 0 : index
    %c0_4 = arith.constant 0 : index
    %4 = vector.load %arg3[%c0_3, %c0_4] : memref<1x256xf32, #tpu.memory_space<vmem>>, vector<1x256xf32>
    %5 = vector.broadcast %4 : vector<1x256xf32> to vector<16x256xf32>
    %6 = arith.addf %3, %5 : vector<16x256xf32>
    %cst_5 = arith.constant 0.000000e+00 : f32
    %cst_6 = arith.constant 6.000000e+00 : f32
    %7 = vector.broadcast %cst_5 : f32 to vector<16x256xf32>
    %8 = arith.maximumf %7, %6 : vector<16x256xf32>
    %9 = vector.broadcast %cst_6 : f32 to vector<16x256xf32>
    %10 = arith.minimumf %9, %8 : vector<16x256xf32>
    %11 = arith.truncf %10 : vector<16x256xf32> to vector<16x256xbf16>
    %c0_7 = arith.constant 0 : index
    %c0_8 = arith.constant 0 : index
    %12 = vector.load %arg4[%c0_7, %c0_8] : memref<256x128xbf16, #tpu.memory_space<vmem>>, vector<256x128xbf16>
    %cst_9 = arith.constant dense<0.000000e+00> : vector<16x128xf32>
    %13 = tpu.matmul %11, %12, %cst_9 {dimension_numbers = #tpu.dot_dimension_numbers<[1], [0], [0], [1], [0, 0, 1, 1], [], []>} : vector<16x256xbf16>, vector<256x128xbf16>, vector<16x128xf32> -> vector<16x128xf32>
    %c0_10 = arith.constant 0 : index
    %c0_11 = arith.constant 0 : index
    %14 = vector.load %arg5[%c0_10, %c0_11] : memref<1x128xf32, #tpu.memory_space<vmem>>, vector<1x128xf32>
    %15 = vector.broadcast %14 : vector<1x128xf32> to vector<16x128xf32>
    %16 = arith.addf %13, %15 : vector<16x128xf32>
    %cst_12 = arith.constant 0.000000e+00 : f32
    %cst_13 = arith.constant 6.000000e+00 : f32
    %17 = vector.broadcast %cst_12 : f32 to vector<16x128xf32>
    %18 = arith.maximumf %17, %16 : vector<16x128xf32>
    %19 = vector.broadcast %cst_13 : f32 to vector<16x128xf32>
    %20 = arith.minimumf %19, %18 : vector<16x128xf32>
    %21 = arith.truncf %20 : vector<16x128xf32> to vector<16x128xbf16>
    %c0_14 = arith.constant 0 : index
    %c0_15 = arith.constant 0 : index
    %22 = vector.load %arg6[%c0_14, %c0_15] : memref<128x16xbf16, #tpu.memory_space<vmem>>, vector<128x16xbf16>
    %cst_16 = arith.constant dense<0.000000e+00> : vector<16x16xf32>
    %23 = tpu.matmul %21, %22, %cst_16 {dimension_numbers = #tpu.dot_dimension_numbers<[1], [0], [0], [1], [0, 0, 1, 1], [], []>} : vector<16x128xbf16>, vector<128x16xbf16>, vector<16x16xf32> -> vector<16x16xf32>
    %c0_17 = arith.constant 0 : index
    %c0_18 = arith.constant 0 : index
    %24 = vector.load %arg7[%c0_17, %c0_18] : memref<1x16xf32, #tpu.memory_space<vmem>>, vector<1x16xf32>
    %25 = vector.broadcast %24 : vector<1x16xf32> to vector<16x16xf32>
    %26 = arith.addf %23, %25 : vector<16x16xf32>
    %c0_19 = arith.constant 0 : index
    %c0_20 = arith.constant 0 : index
    %27 = vector.load %arg8[%c0_19, %c0_20] : memref<16x16xf32, #tpu.memory_space<vmem>>, vector<16x16xf32>
    tpu.vector_store %arg8[%c0_19, %c0_20], %26 {strides = array<i32>} : memref<16x16xf32, #tpu.memory_space<vmem>>, vector<16x16xf32>,
    return
  }
  func.func @transform_0(%arg0: i32) -> (i32, i32) {
    %c0_i32 = arith.constant 0 : i32
    %c0_i32_0 = arith.constant 0 : i32
    return %arg0, %c0_i32 : i32, i32
  }
  func.func @transform_1(%arg0: i32) -> (i32, i32) {
    %c0_i32 = arith.constant 0 : i32
    %c0_i32_0 = arith.constant 0 : i32
    %c0_i32_1 = arith.constant 0 : i32
    return %c0_i32, %c0_i32_0 : i32, i32
  }
  func.func @transform_2(%arg0: i32) -> (i32, i32) {
    %c0_i32 = arith.constant 0 : i32
    %c0_i32_0 = arith.constant 0 : i32
    %c0_i32_1 = arith.constant 0 : i32
    return %c0_i32, %c0_i32_0 : i32, i32
  }
  func.func @transform_3(%arg0: i32) -> (i32, i32) {
    %c0_i32 = arith.constant 0 : i32
    %c0_i32_0 = arith.constant 0 : i32
    %c0_i32_1 = arith.constant 0 : i32
    return %c0_i32, %c0_i32_0 : i32, i32
  }
  func.func @transform_4(%arg0: i32) -> (i32, i32) {
    %c0_i32 = arith.constant 0 : i32
    %c0_i32_0 = arith.constant 0 : i32
    %c0_i32_1 = arith.constant 0 : i32
    return %c0_i32, %c0_i32_0 : i32, i32
  }
  func.func @transform_5(%arg0: i32) -> (i32, i32) {
    %c0_i32 = arith.constant 0 : i32
    %c0_i32_0 = arith.constant 0 : i32
    %c0_i32_1 = arith.constant 0 : i32
    return %c0_i32, %c0_i32_0 : i32, i32
  }
  func.func @transform_6(%arg0: i32) -> (i32, i32) {
    %c0_i32 = arith.constant 0 : i32
    %c0_i32_0 = arith.constant 0 : i32
    %c0_i32_1 = arith.constant 0 : i32
    return %c0_i32, %c0_i32_0 : i32, i32
  }
  func.func @transform_7(%arg0: i32) -> (i32, i32) {
    %c0_i32 = arith.constant 0 : i32
    %c0_i32_0 = arith.constant 0 : i32
    return %arg0, %c0_i32 : i32, i32
  }
}

</mosaic_0001>

<bundles_post_ra>
// kernel: tpu_custom_call.1
= control target key start
LH: loop header
LB: loop body
LE: loop exit
PB: predicated region body
PF: predicated region fallthrough
CT: control target
= control target key end

     0   :  { %12 = vsyncpa [#allocation3], 0  ;;  %s744_s0 = inlined_call_operand.vmem [shape: f32[16,32], index: 0, kind: input, shape index: {}]   ;;  %s745_s1 = inlined_call_operand.vmem [shape: bf16[32,256], index: 1, kind: input, shape index: {}]   ;;  %s746_s2 = inlined_call_operand.vmem [shape: f32[1,256], index: 2, kind: input, shape index: {}]   ;;  %s747_s3 = inlined_call_operand.hbm [shape: bf16[256,128], index: 3, kind: input, shape index: {}]   ;;  %s748_s4 = inlined_call_operand.vmem [shape: f32[1,128], index: 4, kind: input, shape index: {}]   ;;  %s749_s5 = inlined_call_operand.vmem [shape: bf16[128,16], index: 5, kind: input, shape index: {}]   ;;  %s750_s6 = inlined_call_operand.vmem [shape: f32[1,16], index: 6, kind: input, shape index: {}]   ;;  %s751_s7 = inlined_call_operand.hbm [shape: f32[16,16], index: 7, kind: output, shape index: {}]  }
   0x1   :  { %13 = vsyncpa [#allocation4], 0  ;;  %s620_s24 = smov [#allocation2]   ;;  %s572_s28 = scalar_lea.hbm %s747_s3, 2048 }
   0x2   :  { %s25_s25 = sshll.u32 %s620_s24, 4  ;;  %p573_p0 = scmp.ne.s32.totalorder %s747_s3, %s572_s28  ;;  %s26_s25 = int_to_ptr.vmem [resolvable:$true] %s25_s25 }
   0x3   :  { %p576_p1 = scmp.lt.u32.totalorder %s572_s28, %s747_s3 }
   0x5   :  { %p578_p2 = pnand %p576_p1, %p573_p0 }
   0x7   :  { %581 = shalt.err (!%p578_p2)
}
   0x8   :  { %s582_s10 = scalar_lea.vmem %s26_s25, 2048  ;;  %p587_p4 = scmp.lt.s32.totalorder %s26_s25, %s26_s25 }
   0x9   :  { %p583_p3 = scmp.ne.s32.totalorder %s26_s25, %s582_s10  ;;  %p588_p5 = scmp.lt.s32.totalorder %s582_s10, %s582_s10 }
   0xb   :  { %p589_p6 = por %p588_p5, %p587_p4 }
   0xd   :  { %p590_p7 = pnand %p589_p6, %p583_p3 }
   0xf   :  { %593 = shalt.err (!%p590_p7)
}
  0x10   :  { %s621_s11 = smov 64   ;;  %s622_s12 = smov 4  }
  0x11   :  { %31 = dma.hbm_to_vmem [thread:$0]  %s747_s3, 2048, %s26_s25, [#allocation3], %s621_s11, %s621_s11, %s622_s12  }
  0x12   :  { %616 = dma.done.wait [#allocation3], 2048  }
  0x13   :  { %617 = vsyncadd [#allocation3], 4294965248  ;;  %v623_v0 = vmov 0   ;;  %v542_v1 = vld [vmem:[%s745_s1 + $0x4] ss:$8 sps:$4 sm:$0xff]   ;;  %vm81_vm0 = vcmask 261120   ;;  %v51_v30 = vlaneseq }
  0x14   :  { %117 = vmatprep.mubr.bf16.mxu0 %v623_v0  ;;  %v544_v2 = vld [vmem:[%s745_s1] ss:$8 sps:$4 sm:$0xff]   ;;  %85 = vmatprep.subr.bf16.mxu0 %v542_v1  ;;  %v545_v3 = vld [vmem:[%s745_s1 + $0x14] ss:$8 sps:$4 sm:$0xff]   ;;  %v547_v4 = vld [vmem:[%s745_s1 + $0x10] ss:$8 sps:$4 sm:$0xff]  }
  0x15   :  { %v42_v5 = vld [vmem:[%s744_s0] sm:$0xff]  ;;  %86 = vmatpush1.bf16.msra.mxu0 %v544_v2  ;;  %v43_v6 = vld [vmem:[%s744_s0 + $0x8] sm:$0xff]  ;;  %v552_v12 = vld [vmem:[#allocation2 + $0x50] sm:$0xff]   ;;  %v624_v25 = vmov 0.0   ;;  %v52_v31 = vshrl.u32 %v51_v30, 7  ;;  %vm625_vm1 = vmmov 0  }
  0x16   :  { %87 = vmatprep.subr.bf16.mxu0 %v545_v3  ;;  %v548_v7 = vld [vmem:[#allocation2 + $0x40] sm:$0xff]   ;;  %v44_v9 = vpack.c.bf16 %v43_v6, %v42_v5  ;;  %v550_v10 = vld [vmem:[#allocation2 + $0x48] sm:$0xff]   ;;  %v553_v13 = vld [vmem:[#allocation2 + $0x10] sm:$0xff]   ;;  %s626_s21 = smov [#allocation5]   ;;  %vm431_vm2 = vcmask 130048  }
  0x17   :  { %v549_v8 = vld [vmem:[#allocation2] sm:$0xff]   ;;  %482 = vmatprep.subr.bf16.mxu1 %v548_v7  ;;  %v551_v11 = vld [vmem:[#allocation2 + $0x8] sm:$0xff]   ;;  %v554_v14 = vld [vmem:[#allocation2 + $0x58] sm:$0xff]   ;;  %v53_v32 = vsub.s32 0, %v52_v31  ;;  %v57_v34 = vsub.s32 1, %v52_v31  ;;  %s439_s22 = sshll.u32 %s626_s21, 4  ;;  %s440_s22 = int_to_ptr.vmem [resolvable:$true] %s439_s22 }
  0x18   :  { %483 = vmatpush3.bf16.msra.mxu1 %v549_v8  ;;  %v555_v15 = vld [vmem:[#allocation2 + $0x18] sm:$0xff]   ;;  %v556_v16 = vld [vmem:[#allocation2 + $0x60] sm:$0xff]   ;;  %v558_v18 = vld [vmem:[#allocation2 + $0x68] sm:$0xff]   ;;  %p599_p9 = scmp.lt.s32.totalorder %s440_s22, %s440_s22 }
  0x19   :  { %88 = vmatpush1.bf16.msra.mxu0 %v547_v4  ;;  %484 = vmatprep.subr.bf16.mxu1 %v550_v10  ;;  %v557_v17 = vld [vmem:[#allocation2 + $0x20] sm:$0xff]   ;;  %v559_v19 = vld [vmem:[#allocation2 + $0x28] sm:$0xff]   ;;  %v560_v20 = vld [vmem:[#allocation2 + $0x70] sm:$0xff]  }
  0x1a   :  { %v561_v21 = vld [vmem:[#allocation2 + $0x30] sm:$0xff]   ;;  %v562_v22 = vld [vmem:[#allocation2 + $0x78] sm:$0xff]   ;;  %v564_v24 = vld [vmem:[%s749_s5] sm:$0xff]   ;;  %513 = vmatprep.subr.bf16.mxu0 %v624_v25 }
  0x1b   :  { %v563_v23 = vld [vmem:[#allocation2 + $0x38] sm:$0xff]   ;;  %v565_v26 = vld [vmem:[%s749_s5 + $0x8] sm:$0xff]   ;;  %v566_v27 = vld [vmem:[%s749_s5 + $0x10] sm:$0xff]  }
  0x1c   :  { %455 = vmatmul.mubr.msk.bf16.vlgmr.msra.gmra.mrb[0].mxu0 %vm81_vm0, %v44_v9  ;;  %485 = vmatpush3.bf16.msra.mxu1 %v551_v11  ;;  %v567_v28 = vld [vmem:[%s749_s5 + $0x18] sm:$0xff]   ;;  %v568_v29 = vld [vmem:[%s749_s5 + $0x20] sm:$0xff]   ;;  %v569_v55 = vld [vmem:[%s749_s5 + $0x28] sm:$0xff]  }
  0x1d   :  { %486 = vmatprep.subr.bf16.mxu1 %v552_v12  ;;  %514 = vmatpush3.bf16.msra.mxu0 %v564_v24  ;;  %v49_v33 = vld [vmem:[%s746_s2] sm:$0x3]  ;;  %v570_v56 = vld [vmem:[%s749_s5 + $0x30] sm:$0xff]   ;;  %v571_v57 = vld [vmem:[%s749_s5 + $0x38] sm:$0xff]  }
  0x1e   :  { %515 = vmatprep.subr.bf16.mxu0 %v624_v25  ;;  %v54_v35 = vrot.slane %v49_v33, %v53_v32  ;;  %v58_v36 = vrot.slane %v49_v33, %v57_v34  ;;  %529 = vmatprep.mubr.msk.bf16.mxu0 %vm625_vm1, %v624_v25  ;;  %v456_v59 = vld [vmem:[%s748_s4] ss:$0 sm:$0xff]  ;;  %s594_s4 = scalar_lea.vmem %s440_s22, 256 }
  0x1f   :  { %v473_v8 = vld [vmem:[%s750_s6] ss:$0 sm:$0xff]  ;;  %p595_p8 = scmp.ne.s32.totalorder %s440_s22, %s594_s4  ;;  %p600_p10 = scmp.lt.s32.totalorder %s594_s4, %s594_s4 }
  0x20   :  { %487 = vmatpush3.bf16.msra.mxu1 %v553_v13 }
  0x21   :  { %488 = vmatprep.subr.bf16.mxu1 %v554_v14  ;;  %516 = vmatpush3.bf16.msra.mxu0 %v565_v26  ;;  %p601_p11 = por %p600_p10, %p599_p9 }
  0x22   :  { %517 = vmatprep.subr.bf16.mxu0 %v624_v25 }
  0x23   :  { %p602_p12 = pnand %p601_p11, %p595_p8 }
  0x24   :  { %489 = vmatpush3.bf16.msra.mxu1 %v555_v15 }
  0x25   :  { %490 = vmatprep.subr.bf16.mxu1 %v556_v16  ;;  %518 = vmatpush3.bf16.msra.mxu0 %v566_v27 }
  0x26   :  { %519 = vmatprep.subr.bf16.mxu0 %v624_v25 }
  0x28   :  { %491 = vmatpush3.bf16.msra.mxu1 %v557_v17 }
  0x29   :  { %492 = vmatprep.subr.bf16.mxu1 %v558_v18  ;;  %520 = vmatpush3.bf16.msra.mxu0 %v567_v28 }
  0x2a   :  { %521 = vmatprep.subr.bf16.mxu0 %v624_v25 }
  0x2c   :  { %493 = vmatpush3.bf16.msra.mxu1 %v559_v19 }
  0x2d   :  { %494 = vmatprep.subr.bf16.mxu1 %v560_v20  ;;  %522 = vmatpush3.bf16.msra.mxu0 %v568_v29 }
  0x2e   :  { %523 = vmatprep.subr.bf16.mxu0 %v624_v25 }
  0x30   :  { %495 = vmatpush3.bf16.msra.mxu1 %v561_v21 }
  0x31   :  { %496 = vmatprep.subr.bf16.mxu1 %v562_v22  ;;  %524 = vmatpush3.bf16.msra.mxu0 %v569_v55 }
  0x32   :  { %525 = vmatprep.subr.bf16.mxu0 %v624_v25 }
  0x34   :  { %497 = vmatpush3.bf16.msra.mxu1 %v563_v23 }
  0x35   :  { %526 = vmatpush3.bf16.msra.mxu0 %v570_v56 }
  0x36   :  { %527 = vmatprep.subr.bf16.mxu0 %v624_v25 }
  0x39   :  { %528 = vmatpush3.bf16.msra.mxu0 %v571_v57 }
  0xef   :  { %v119_v37 = vpop.f32.mrb[0].mxu0 }
  0xf0   :  { %v120_v38 = vadd.f32 %v119_v37, %v54_v35  ;;  %v121_v39 = vpop.f32.mrb[1].mxu0 }
  0xf1   :  { %v122_v40 = vadd.f32 %v121_v39, %v58_v36  ;;  %v123_v41 = vpop.f32.mrb[2].mxu0 }
  0xf2   :  { %v128_v42 = vmax.f32 %v120_v38, 0.0  ;;  %v124_v43 = vadd.f32 %v123_v41, %v54_v35  ;;  %v125_v44 = vpop.f32.mrb[3].mxu0 }
  0xf3   :  { %v129_v45 = vmax.f32 %v122_v40, 0.0  ;;  %v126_v46 = vadd.f32 %v125_v44, %v58_v36 }
  0xf4   :  { %v130_v47 = vmax.f32 %v124_v43, 0.0  ;;  %v132_v49 = vmin.f32 %v128_v42, 6.0 }
  0xf5   :  { %v131_v48 = vmax.f32 %v126_v46, 0.0  ;;  %v133_v51 = vmin.f32 %v129_v45, 6.0 }
  0xf6   :  { %v134_v50 = vmin.f32 %v130_v47, 6.0 }
  0xf7   :  { %v135_v52 = vmin.f32 %v131_v48, 6.0 }
  0xf8   :  { %v136_v53 = vpack.c.bf16 %v134_v50, %v132_v49 }
  0xf9   :  { %v137_v54 = vpack.c.bf16 %v135_v52, %v133_v51 }
  0xfb   :  { %305 = vmatprep.mubr.bf16.mxu1 %v137_v54 }
  0xfc   :  { %306 = vmatmul.mubr.bf16.vlgmr.msra.gmra.mrb[0].mxu1 %v136_v53 }
 0x1cf   :  { %v498_v58 = vpop.f32.mrb[0].mxu1 }
 0x1d0   :  { %v499_v60 = vpop.f32.mrb[1].mxu1 }
 0x1d1   :  { %v500_v61 = vadd.f32 %v499_v60, %v498_v58  ;;  %v501_v62 = vpop.f32.mrb[2].mxu1 }
 0x1d2   :  { %v502_v63 = vpop.f32.mrb[3].mxu1 }
 0x1d3   :  { %v308_v0 = vadd.f32 %v500_v61, %v456_v59  ;;  %v503_v1 = vadd.f32 %v502_v63, %v501_v62 }
 0x1d5   :  { %v314_v2 = vmax.f32 %v308_v0, 0.0  ;;  %v311_v3 = vadd.f32 %v503_v1, %v456_v59 }
 0x1d7   :  { %v315_v4 = vmax.f32 %v311_v3, 0.0  ;;  %v316_v5 = vmin.f32 %v314_v2, 6.0 }
 0x1d9   :  { %v317_v6 = vmin.f32 %v315_v4, 6.0 }
 0x1db   :  { %v318_v7 = vpack.c.bf16 %v317_v6, %v316_v5 }
 0x1dd   :  { %530 = vmatmul.mubr.bf16.vlgmr.msra.gmra.mrb[4].mxu0 %v318_v7 }
 0x2b0   :  { %v424_v9 = vpop.f32.mrb[4].mxu0 }
 0x2b1   :  { %v425_v10 = vadd.f32 %v473_v8, %v424_v9  ;;  %v531_v11 = vpop.f32.mrb[5].mxu0 }
 0x2b2   :  { %v427_v12 = vpop.f32.mrb[6].mxu0 }
 0x2b3   :  { %432 = vst.msk [vmem:[#allocation5] sm:$0xff] %vm431_vm2, %v425_v10  ;;  %v428_v13 = vadd.f32 %v473_v8, %v427_v12  ;;  %v532_v14 = vpop.f32.mrb[7].mxu0 }
 0x2b5   :  { %433 = vst.msk [vmem:[#allocation5 + $0x8] sm:$0xff] %vm431_vm2, %v428_v13 }
 0x2b6   :  { %605 = shalt.err (!%p602_p12)
}
 0x2b7   :  { %s606_s23 = scalar_lea.hbm %s751_s7, 256 }
 0x2b8   :  { %p607_p13 = scmp.ne.s32.totalorder %s751_s7, %s606_s23  ;;  %p610_p0 = scmp.lt.u32.totalorder %s606_s23, %s751_s7 }
 0x2ba   :  { %p612_p1 = pnand %p610_p0, %p607_p13 }
 0x2bc   :  { %615 = shalt.err (!%p612_p1)
}
 0x2bd   :  { %s627_s26 = smov 128   ;;  %s628_s27 = smov 8  }
 0x2be   :  { %445 = dma.vmem_to_hbm [thread:$0]  %s440_s22, 256, %s751_s7, [#allocation4], %s627_s26, %s627_s26, %s628_s27  }
 0x2bf   :  { %618 = dma.done.wait [#allocation4], 256  }
 0x2c0   :  { %619 = vsyncadd [#allocation4], 4294967040 }
 0x2c1   :  { %449 = vsyncpa [#allocation3], 1 }
 0x2c2   :  { %450 = vsyncpa [#allocation4], 1 }

</bundles_post_ra>
